<compile_context>
chip_gen: v5e
topology: v5e:2x2
jax: 0.10.0
libtpu: 0.0.40
codegen_flags: <defaults>
</compile_context>

<pallas_src>
import functools

import jax
import jax.numpy as jnp
from jax.experimental import pallas as pl


# ----------------------------------------------------------------------------
# Fused forward kernel: encoder -> reparam -> decoder, all in VMEM/registers.
# ----------------------------------------------------------------------------
def _cama_fused_kernel(*refs, infer_m):
    (x_ref, y_ref, eps_m_ref, eps_z_ref,
     w_enc_x, b_enc_x,
     w_qm_mu, b_qm_mu, w_qm_lv, b_qm_lv,
     w_qz_hx, w_qz_y, w_qz_m, b_qz_h,
     w_qz_mu, b_qz_mu, w_qz_lv, b_qz_lv,
     w_dec_y, b_dec_y, w_dec_z, b_dec_z, w_dec_m, b_dec_m,
     w_dec_hy, w_dec_hz, w_dec_hm, b_dec_h,
     w_dec_out, b_dec_out,
     x_recon_ref) = refs

    dot = functools.partial(jnp.dot, preferred_element_type=jnp.float32)
    relu = lambda v: jnp.maximum(v, 0.0)

    x = x_ref[...]           # (Bp, x_dim)
    y = y_ref[...]           # (Bp, dim_y)

    # ---------------- VariationalEncoder ----------------
    h_x = relu(dot(x, w_enc_x[...]) + b_enc_x[...])          # (Bp, hidden)

    if infer_m:
        # q(m | x) + reparameterization (EUP exp, stays in registers)
        m_mu = dot(h_x, w_qm_mu[...]) + b_qm_mu[...]
        m_lv = dot(h_x, w_qm_lv[...]) + b_qm_lv[...]
        m = m_mu + jnp.exp(0.5 * m_lv) * eps_m_ref[...]       # (Bp, dim_m)
    else:
        # m == 0 (prior mean): its matmul contributions are skipped below.
        m = None

    # q(z | x, y, m): concat eliminated -> split-K accumulated dots
    h_z = dot(h_x, w_qz_hx[...]) + dot(y, w_qz_y[...]) + b_qz_h[...]
    if infer_m:
        h_z = h_z + dot(m, w_qz_m[...])
    h_z = relu(h_z)                                           # (Bp, hidden)

    z_mu = dot(h_z, w_qz_mu[...]) + b_qz_mu[...]
    z_lv = dot(h_z, w_qz_lv[...]) + b_qz_lv[...]
    z = z_mu + jnp.exp(0.5 * z_lv) * eps_z_ref[...]           # (Bp, dim_z)

    # ---------------- Decoder p(x | y, z, m) ----------------
    h_y = relu(dot(y, w_dec_y[...]) + b_dec_y[...])           # (Bp, hidden)
    h_zd = relu(dot(z, w_dec_z[...]) + b_dec_z[...])          # (Bp, hidden)
    if infer_m:
        h_m = relu(dot(m, w_dec_m[...]) + b_dec_m[...])       # (Bp, hidden)
    else:
        # m == 0  ->  h_m = relu(bias); the (1, hidden) row broadcasts below.
        h_m = relu(b_dec_m[...])

    # concat([h_y, h_z, h_m]) @ W_dec_h, again as accumulated block dots
    h = relu(dot(h_y, w_dec_hy[...]) + dot(h_zd, w_dec_hz[...])
             + dot(h_m, w_dec_hm[...]) + b_dec_h[...])        # (Bp, hidden)

    # Only HBM-visible output: lane-dense (Bp, x_dim) reconstruction.
    x_recon_ref[...] = (dot(h, w_dec_out[...]) + b_dec_out[...]).astype(
        x_recon_ref.dtype)


# ----------------------------------------------------------------------------
# Parameter initialization (deterministic, in-script).  Concat-layer weights
# are created at full width and split row-wise so the in-kernel block dots are
# mathematically identical to concat(...) @ W.
# ----------------------------------------------------------------------------
def _init_linear(key, fan_in, fan_out):
    kw, kb = jax.random.split(key)
    scale = 1.0 / jnp.sqrt(jnp.float32(fan_in))
    w = jax.random.normal(kw, (fan_in, fan_out), jnp.float32) * scale
    b = (jax.random.normal(kb, (fan_out,), jnp.float32) * 0.01).reshape(1, fan_out)
    return w, b


def init_params(dim_y, dim_z, dim_m, x_dim, hidden):
    keys = jax.random.split(jax.random.PRNGKey(42), 11)
    p = {}
    # --- VariationalEncoder ---
    p["w_enc_x"], p["b_enc_x"] = _init_linear(keys[0], x_dim, hidden)
    p["w_qm_mu"], p["b_qm_mu"] = _init_linear(keys[1], hidden, dim_m)
    p["w_qm_lv"], p["b_qm_lv"] = _init_linear(keys[2], hidden, dim_m)
    w_qz_h, p["b_qz_h"] = _init_linear(keys[3], hidden + dim_y + dim_m, hidden)
    p["w_qz_hx"] = w_qz_h[:hidden]
    p["w_qz_y"] = w_qz_h[hidden:hidden + dim_y]
    p["w_qz_m"] = w_qz_h[hidden + dim_y:]
    p["w_qz_mu"], p["b_qz_mu"] = _init_linear(keys[4], hidden, dim_z)
    p["w_qz_lv"], p["b_qz_lv"] = _init_linear(keys[5], hidden, dim_z)
    # --- Decoder p(x|y,z,m) ---
    p["w_dec_y"], p["b_dec_y"] = _init_linear(keys[6], dim_y, hidden)
    p["w_dec_z"], p["b_dec_z"] = _init_linear(keys[7], dim_z, hidden)
    p["w_dec_m"], p["b_dec_m"] = _init_linear(keys[8], dim_m, hidden)
    w_dec_h, p["b_dec_h"] = _init_linear(keys[9], 3 * hidden, hidden)
    p["w_dec_hy"] = w_dec_h[:hidden]
    p["w_dec_hz"] = w_dec_h[hidden:2 * hidden]
    p["w_dec_hm"] = w_dec_h[2 * hidden:]
    p["w_dec_out"], p["b_dec_out"] = _init_linear(keys[10], hidden, x_dim)
    return p


PARAM_ORDER = (
    "w_enc_x", "b_enc_x",
    "w_qm_mu", "b_qm_mu", "w_qm_lv", "b_qm_lv",
    "w_qz_hx", "w_qz_y", "w_qz_m", "b_qz_h",
    "w_qz_mu", "b_qz_mu", "w_qz_lv", "b_qz_lv",
    "w_dec_y", "b_dec_y", "w_dec_z", "b_dec_z", "w_dec_m", "b_dec_m",
    "w_dec_hy", "w_dec_hz", "w_dec_hm", "b_dec_h",
    "w_dec_out", "b_dec_out",
)


# ----------------------------------------------------------------------------
# CAMA forward:  m, z = encoder(x, y, infer_m);  x_recon = decoder(y, z, m)
# ----------------------------------------------------------------------------
@functools.partial(jax.jit, static_argnames=("infer_m",))
def cama_forward(params, x, y, key, *, infer_m=False):
    """x: (B, C, H, W) NCHW; y: (B, dim_y) one-hot.  Returns x_recon, same shape as x."""
    B, C, H, W = x.shape
    x_dim = C * H * W
    dim_m = params["w_qm_mu"].shape[1]
    dim_z = params["w_qz_mu"].shape[1]

    k_m, k_z = jax.random.split(key)
    eps_m = jax.random.normal(k_m, (B, dim_m), jnp.float32)
    eps_z = jax.random.normal(k_z, (B, dim_z), jnp.float32)

    # Pad the batch dim to a sublane multiple (>= 8) so the fused kernel works
    # on full vregs; padded rows are zero and are discarded after the call.
    Bp = max(8, ((B + 7) // 8) * 8)
    pad = lambda a: jnp.pad(a, ((0, Bp - B), (0, 0)))

    x_flat = pad(x.reshape(B, x_dim).astype(jnp.float32))
    y_p = pad(y.astype(jnp.float32))
    eps_m_p = pad(eps_m)
    eps_z_p = pad(eps_z)

    weights = tuple(params[k] for k in PARAM_ORDER)

    # Single kernel invocation (no grid): every operand fits comfortably in
    # VMEM (~100 KiB total at these sizes) and is mapped in whole.
    x_recon = pl.pallas_call(
        functools.partial(_cama_fused_kernel, infer_m=infer_m),
        out_shape=jax.ShapeDtypeStruct((Bp, x_dim), jnp.float32),
    )(x_flat, y_p, eps_m_p, eps_z_p, *weights)

    return x_recon[:B].reshape(B, C, H, W)


# ----------------------------------------------------------------------------
if __name__ == "__main__":
    B, C, H, W = 2, 1, 16, 16
    dim_y, dim_z, dim_m = 4, 8, 8
    hidden = 32

    params = init_params(dim_y, dim_z, dim_m, C * H * W, hidden)

    key = jax.random.PRNGKey(0)
    kx, ky, k0, k1 = jax.random.split(key, 4)
    x = jax.random.normal(kx, (B, C, H, W), jnp.float32)
    y_idx = jax.random.randint(ky, (B,), 0, dim_y)
    y = jax.nn.one_hot(y_idx, dim_y, dtype=jnp.float32)

    # default path (infer_m=False, matching the PyTorch forward default)
    x_recon = cama_forward(params, x, y, k0, infer_m=False)
    jax.block_until_ready(x_recon)
    # manipulation-inference path (independent eps key, per review note)
    x_recon_m = cama_forward(params, x, y, k1, infer_m=True)
    jax.block_until_ready(x_recon_m)

    assert x_recon.shape == x.shape
    assert x_recon_m.shape == x.shape
    assert bool(jnp.all(jnp.isfinite(x_recon))) and bool(jnp.all(jnp.isfinite(x_recon_m)))
    print("KERNEL_OK")
</pallas_src>

<mosaic_0001>
module attributes {stable_mosaic.version = 11 : i64} {
  func.func @_cama_fused_kernel(%arg0: memref<8x256xf32, #tpu.memory_space<vmem>>, %arg1: memref<8x4xf32, #tpu.memory_space<vmem>>, %arg2: memref<8x8xf32, #tpu.memory_space<vmem>>, %arg3: memref<8x8xf32, #tpu.memory_space<vmem>>, %arg4: memref<256x32xf32, #tpu.memory_space<vmem>>, %arg5: memref<1x32xf32, #tpu.memory_space<vmem>>, %arg6: memref<32x8xf32, #tpu.memory_space<vmem>>, %arg7: memref<1x8xf32, #tpu.memory_space<vmem>>, %arg8: memref<32x8xf32, #tpu.memory_space<vmem>>, %arg9: memref<1x8xf32, #tpu.memory_space<vmem>>, %arg10: memref<32x32xf32, #tpu.memory_space<vmem>>, %arg11: memref<4x32xf32, #tpu.memory_space<vmem>>, %arg12: memref<8x32xf32, #tpu.memory_space<vmem>>, %arg13: memref<1x32xf32, #tpu.memory_space<vmem>>, %arg14: memref<32x8xf32, #tpu.memory_space<vmem>>, %arg15: memref<1x8xf32, #tpu.memory_space<vmem>>, %arg16: memref<32x8xf32, #tpu.memory_space<vmem>>, %arg17: memref<1x8xf32, #tpu.memory_space<vmem>>, %arg18: memref<4x32xf32, #tpu.memory_space<vmem>>, %arg19: memref<1x32xf32, #tpu.memory_space<vmem>>, %arg20: memref<8x32xf32, #tpu.memory_space<vmem>>, %arg21: memref<1x32xf32, #tpu.memory_space<vmem>>, %arg22: memref<8x32xf32, #tpu.memory_space<vmem>>, %arg23: memref<1x32xf32, #tpu.memory_space<vmem>>, %arg24: memref<32x32xf32, #tpu.memory_space<vmem>>, %arg25: memref<32x32xf32, #tpu.memory_space<vmem>>, %arg26: memref<32x32xf32, #tpu.memory_space<vmem>>, %arg27: memref<1x32xf32, #tpu.memory_space<vmem>>, %arg28: memref<32x256xf32, #tpu.memory_space<vmem>>, %arg29: memref<1x256xf32, #tpu.memory_space<vmem>>, %arg30: memref<8x256xf32, #tpu.memory_space<vmem>>) attributes {dimension_semantics = [], scalar_prefetch = 0 : i64, scratch_operands = 0 : i64, tpu.core_type = #tpu.core_type<tc>} {
    %c0 = arith.constant 0 : index
    %c0_0 = arith.constant 0 : index
    %0 = vector.load %arg0[%c0, %c0_0] : memref<8x256xf32, #tpu.memory_space<vmem>>, vector<8x256xf32>
    %c0_1 = arith.constant 0 : index
    %c0_2 = arith.constant 0 : index
    %1 = vector.load %arg1[%c0_1, %c0_2] : memref<8x4xf32, #tpu.memory_space<vmem>>, vector<8x4xf32>
    %c0_3 = arith.constant 0 : index
    %c0_4 = arith.constant 0 : index
    %2 = vector.load %arg4[%c0_3, %c0_4] : memref<256x32xf32, #tpu.memory_space<vmem>>, vector<256x32xf32>
    %cst = arith.constant dense<0.000000e+00> : vector<8x32xf32>
    %3 = tpu.matmul %0, %2, %cst {dimension_numbers = #tpu.dot_dimension_numbers<[1], [0], [0], [1], [0, 0, 1, 1], [], []>} : vector<8x256xf32>, vector<256x32xf32>, vector<8x32xf32> -> vector<8x32xf32>
    %c0_5 = arith.constant 0 : index
    %c0_6 = arith.constant 0 : index
    %4 = vector.load %arg5[%c0_5, %c0_6] : memref<1x32xf32, #tpu.memory_space<vmem>>, vector<1x32xf32>
    %5 = vector.broadcast %4 : vector<1x32xf32> to vector<8x32xf32>
    %6 = arith.addf %3, %5 : vector<8x32xf32>
    %cst_7 = arith.constant 0.000000e+00 : f32
    %7 = vector.broadcast %cst_7 : f32 to vector<8x32xf32>
    %8 = arith.maximumf %6, %7 : vector<8x32xf32>
    %c0_8 = arith.constant 0 : index
    %c0_9 = arith.constant 0 : index
    %9 = vector.load %arg10[%c0_8, %c0_9] : memref<32x32xf32, #tpu.memory_space<vmem>>, vector<32x32xf32>
    %cst_10 = arith.constant dense<0.000000e+00> : vector<8x32xf32>
    %10 = tpu.matmul %8, %9, %cst_10 {dimension_numbers = #tpu.dot_dimension_numbers<[1], [0], [0], [1], [0, 0, 1, 1], [], []>} : vector<8x32xf32>, vector<32x32xf32>, vector<8x32xf32> -> vector<8x32xf32>
    %c0_11 = arith.constant 0 : index
    %c0_12 = arith.constant 0 : index
    %11 = vector.load %arg11[%c0_11, %c0_12] : memref<4x32xf32, #tpu.memory_space<vmem>>, vector<4x32xf32>
    %cst_13 = arith.constant dense<0.000000e+00> : vector<8x32xf32>
    %12 = tpu.matmul %1, %11, %cst_13 {dimension_numbers = #tpu.dot_dimension_numbers<[1], [0], [0], [1], [0, 0, 1, 1], [], []>} : vector<8x4xf32>, vector<4x32xf32>, vector<8x32xf32> -> vector<8x32xf32>
    %13 = arith.addf %10, %12 : vector<8x32xf32>
    %c0_14 = arith.constant 0 : index
    %c0_15 = arith.constant 0 : index
    %14 = vector.load %arg13[%c0_14, %c0_15] : memref<1x32xf32, #tpu.memory_space<vmem>>, vector<1x32xf32>
    %15 = vector.broadcast %14 : vector<1x32xf32> to vector<8x32xf32>
    %16 = arith.addf %13, %15 : vector<8x32xf32>
    %cst_16 = arith.constant 0.000000e+00 : f32
    %17 = vector.broadcast %cst_16 : f32 to vector<8x32xf32>
    %18 = arith.maximumf %16, %17 : vector<8x32xf32>
    %c0_17 = arith.constant 0 : index
    %c0_18 = arith.constant 0 : index
    %19 = vector.load %arg14[%c0_17, %c0_18] : memref<32x8xf32, #tpu.memory_space<vmem>>, vector<32x8xf32>
    %cst_19 = arith.constant dense<0.000000e+00> : vector<8x8xf32>
    %20 = tpu.matmul %18, %19, %cst_19 {dimension_numbers = #tpu.dot_dimension_numbers<[1], [0], [0], [1], [0, 0, 1, 1], [], []>} : vector<8x32xf32>, vector<32x8xf32>, vector<8x8xf32> -> vector<8x8xf32>
    %c0_20 = arith.constant 0 : index
    %c0_21 = arith.constant 0 : index
    %21 = vector.load %arg15[%c0_20, %c0_21] : memref<1x8xf32, #tpu.memory_space<vmem>>, vector<1x8xf32>
    %22 = vector.broadcast %21 : vector<1x8xf32> to vector<8x8xf32>
    %23 = arith.addf %20, %22 : vector<8x8xf32>
    %c0_22 = arith.constant 0 : index
    %c0_23 = arith.constant 0 : index
    %24 = vector.load %arg16[%c0_22, %c0_23] : memref<32x8xf32, #tpu.memory_space<vmem>>, vector<32x8xf32>
    %cst_24 = arith.constant dense<0.000000e+00> : vector<8x8xf32>
    %25 = tpu.matmul %18, %24, %cst_24 {dimension_numbers = #tpu.dot_dimension_numbers<[1], [0], [0], [1], [0, 0, 1, 1], [], []>} : vector<8x32xf32>, vector<32x8xf32>, vector<8x8xf32> -> vector<8x8xf32>
    %c0_25 = arith.constant 0 : index
    %c0_26 = arith.constant 0 : index
    %26 = vector.load %arg17[%c0_25, %c0_26] : memref<1x8xf32, #tpu.memory_space<vmem>>, vector<1x8xf32>
    %27 = vector.broadcast %26 : vector<1x8xf32> to vector<8x8xf32>
    %28 = arith.addf %25, %27 : vector<8x8xf32>
    %cst_27 = arith.constant 5.000000e-01 : f32
    %29 = vector.broadcast %cst_27 : f32 to vector<8x8xf32>
    %30 = arith.mulf %29, %28 : vector<8x8xf32>
    %31 = math.exp %30 : vector<8x8xf32>
    %c0_28 = arith.constant 0 : index
    %c0_29 = arith.constant 0 : index
    %32 = vector.load %arg3[%c0_28, %c0_29] : memref<8x8xf32, #tpu.memory_space<vmem>>, vector<8x8xf32>
    %33 = arith.mulf %31, %32 : vector<8x8xf32>
    %34 = arith.addf %23, %33 : vector<8x8xf32>
    %c0_30 = arith.constant 0 : index
    %c0_31 = arith.constant 0 : index
    %35 = vector.load %arg18[%c0_30, %c0_31] : memref<4x32xf32, #tpu.memory_space<vmem>>, vector<4x32xf32>
    %cst_32 = arith.constant dense<0.000000e+00> : vector<8x32xf32>
    %36 = tpu.matmul %1, %35, %cst_32 {dimension_numbers = #tpu.dot_dimension_numbers<[1], [0], [0], [1], [0, 0, 1, 1], [], []>} : vector<8x4xf32>, vector<4x32xf32>, vector<8x32xf32> -> vector<8x32xf32>
    %c0_33 = arith.constant 0 : index
    %c0_34 = arith.constant 0 : index
    %37 = vector.load %arg19[%c0_33, %c0_34] : memref<1x32xf32, #tpu.memory_space<vmem>>, vector<1x32xf32>
    %38 = vector.broadcast %37 : vector<1x32xf32> to vector<8x32xf32>
    %39 = arith.addf %36, %38 : vector<8x32xf32>
    %cst_35 = arith.constant 0.000000e+00 : f32
    %40 = vector.broadcast %cst_35 : f32 to vector<8x32xf32>
    %41 = arith.maximumf %39, %40 : vector<8x32xf32>
    %c0_36 = arith.constant 0 : index
    %c0_37 = arith.constant 0 : index
    %42 = vector.load %arg20[%c0_36, %c0_37] : memref<8x32xf32, #tpu.memory_space<vmem>>, vector<8x32xf32>
    %cst_38 = arith.constant dense<0.000000e+00> : vector<8x32xf32>
    %43 = tpu.matmul %34, %42, %cst_38 {dimension_numbers = #tpu.dot_dimension_numbers<[1], [0], [0], [1], [0, 0, 1, 1], [], []>} : vector<8x8xf32>, vector<8x32xf32>, vector<8x32xf32> -> vector<8x32xf32>
    %c0_39 = arith.constant 0 : index
    %c0_40 = arith.constant 0 : index
    %44 = vector.load %arg21[%c0_39, %c0_40] : memref<1x32xf32, #tpu.memory_space<vmem>>, vector<1x32xf32>
    %45 = vector.broadcast %44 : vector<1x32xf32> to vector<8x32xf32>
    %46 = arith.addf %43, %45 : vector<8x32xf32>
    %cst_41 = arith.constant 0.000000e+00 : f32
    %47 = vector.broadcast %cst_41 : f32 to vector<8x32xf32>
    %48 = arith.maximumf %46, %47 : vector<8x32xf32>
    %c0_42 = arith.constant 0 : index
    %c0_43 = arith.constant 0 : index
    %49 = vector.load %arg23[%c0_42, %c0_43] : memref<1x32xf32, #tpu.memory_space<vmem>>, vector<1x32xf32>
    %cst_44 = arith.constant 0.000000e+00 : f32
    %50 = vector.broadcast %cst_44 : f32 to vector<1x32xf32>
    %51 = arith.maximumf %49, %50 : vector<1x32xf32>
    %c0_45 = arith.constant 0 : index
    %c0_46 = arith.constant 0 : index
    %52 = vector.load %arg24[%c0_45, %c0_46] : memref<32x32xf32, #tpu.memory_space<vmem>>, vector<32x32xf32>
    %cst_47 = arith.constant dense<0.000000e+00> : vector<8x32xf32>
    %53 = tpu.matmul %41, %52, %cst_47 {dimension_numbers = #tpu.dot_dimension_numbers<[1], [0], [0], [1], [0, 0, 1, 1], [], []>} : vector<8x32xf32>, vector<32x32xf32>, vector<8x32xf32> -> vector<8x32xf32>
    %c0_48 = arith.constant 0 : index
    %c0_49 = arith.constant 0 : index
    %54 = vector.load %arg25[%c0_48, %c0_49] : memref<32x32xf32, #tpu.memory_space<vmem>>, vector<32x32xf32>
    %cst_50 = arith.constant dense<0.000000e+00> : vector<8x32xf32>
    %55 = tpu.matmul %48, %54, %cst_50 {dimension_numbers = #tpu.dot_dimension_numbers<[1], [0], [0], [1], [0, 0, 1, 1], [], []>} : vector<8x32xf32>, vector<32x32xf32>, vector<8x32xf32> -> vector<8x32xf32>
    %56 = arith.addf %53, %55 : vector<8x32xf32>
    %c0_51 = arith.constant 0 : index
    %c0_52 = arith.constant 0 : index
    %57 = vector.load %arg26[%c0_51, %c0_52] : memref<32x32xf32, #tpu.memory_space<vmem>>, vector<32x32xf32>
    %cst_53 = arith.constant dense<0.000000e+00> : vector<1x32xf32>
    %58 = tpu.matmul %51, %57, %cst_53 {dimension_numbers = #tpu.dot_dimension_numbers<[1], [0], [0], [1], [0, 0, 1, 1], [], []>} : vector<1x32xf32>, vector<32x32xf32>, vector<1x32xf32> -> vector<1x32xf32>
    %59 = vector.broadcast %58 : vector<1x32xf32> to vector<8x32xf32>
    %60 = arith.addf %56, %59 : vector<8x32xf32>
    %c0_54 = arith.constant 0 : index
    %c0_55 = arith.constant 0 : index
    %61 = vector.load %arg27[%c0_54, %c0_55] : memref<1x32xf32, #tpu.memory_space<vmem>>, vector<1x32xf32>
    %62 = vector.broadcast %61 : vector<1x32xf32> to vector<8x32xf32>
    %63 = arith.addf %60, %62 : vector<8x32xf32>
    %cst_56 = arith.constant 0.000000e+00 : f32
    %64 = vector.broadcast %cst_56 : f32 to vector<8x32xf32>
    %65 = arith.maximumf %63, %64 : vector<8x32xf32>
    %c0_57 = arith.constant 0 : index
    %c0_58 = arith.constant 0 : index
    %66 = vector.load %arg28[%c0_57, %c0_58] : memref<32x256xf32, #tpu.memory_space<vmem>>, vector<32x256xf32>
    %cst_59 = arith.constant dense<0.000000e+00> : vector<8x256xf32>
    %67 = tpu.matmul %65, %66, %cst_59 {dimension_numbers = #tpu.dot_dimension_numbers<[1], [0], [0], [1], [0, 0, 1, 1], [], []>} : vector<8x32xf32>, vector<32x256xf32>, vector<8x256xf32> -> vector<8x256xf32>
    %c0_60 = arith.constant 0 : index
    %c0_61 = arith.constant 0 : index
    %68 = vector.load %arg29[%c0_60, %c0_61] : memref<1x256xf32, #tpu.memory_space<vmem>>, vector<1x256xf32>
    %69 = vector.broadcast %68 : vector<1x256xf32> to vector<8x256xf32>
    %70 = arith.addf %67, %69 : vector<8x256xf32>
    %c0_62 = arith.constant 0 : index
    %c0_63 = arith.constant 0 : index
    %71 = vector.load %arg30[%c0_62, %c0_63] : memref<8x256xf32, #tpu.memory_space<vmem>>, vector<8x256xf32>
    tpu.vector_store %arg30[%c0_62, %c0_63], %70 {strides = array<i32>} : memref<8x256xf32, #tpu.memory_space<vmem>>, vector<8x256xf32>,
    return
  }
}

</mosaic_0001>

<bundles_post_ra>
// kernel: cama_forward.1
= control target key start
LH: loop header
LB: loop body
LE: loop exit
PB: predicated region body
PF: predicated region fallthrough
CT: control target
= control target key end

     0   :  { %s615_s3 = smov 4   ;;  %s616_s7 = smov 5   ;;  %vm215_vm0 = vcmask 1043456   ;;  %vm211_vm1 = vcmask 31744   ;;  %vm239_vm2 = vcmask 261120   ;;  %vm368_vm3 = vcmask 64512   ;;  %s791_s0 = inlined_call_operand.smem [shape: u32[31], index: -1, kind: input, shape index: {}] }
   0x1   :  { %s646_s6 = sld [smem:[%s791_s0 + %s615_s3]]   ;;  %s617_s14 = smov 10  }
   0x2   :  { %s659_s10 = sld [smem:[%s791_s0 + %s616_s7]]   ;;  %s618_s18 = smov 11  }
   0x3   :  { %s1_s13 = sld [smem:[%s791_s0]]   ;;  %s619_s22 = smov 1  }
   0x4   :  { %s551_s17 = sld [smem:[%s791_s0 + %s617_s14]]   ;;  %s620_s26 = smov 16  }
   0x5   :  { %s552_s21 = sld [smem:[%s791_s0 + %s618_s18]]   ;;  %s621_s30 = smov 13  }
   0x6   :  { %s547_s25 = sld [smem:[%s791_s0 + %s619_s22]]   ;;  %s622_s4 = smov 15  }
   0x7   :  { %v144_v0 = vld [vmem:[%s646_s6 + $0x78] sm:$0xff]  ;;  %v143_v1 = vld [vmem:[%s646_s6 + $0x70] sm:$0xff]  ;;  %v142_v4 = vld [vmem:[%s646_s6 + $0x68] sm:$0xff]  ;;  %s700_s29 = sld [smem:[%s791_s0 + %s620_s26]]   ;;  %s623_s8 = smov 14  }
   0x8   :  { %v160_v2 = vld [vmem:[%s646_s6 + $0xf8] sm:$0xff]  ;;  %165 = vmatpush.msra.mxu0 %v144_v0  ;;  %v159_v3 = vld [vmem:[%s646_s6 + $0xf0] sm:$0xff]  ;;  %v158_v5 = vld [vmem:[%s646_s6 + $0xe8] sm:$0xff]  ;;  %s553_s3 = sld [smem:[%s791_s0 + %s621_s30]]   ;;  %s624_s12 = smov 17  }
   0x9   :  { %185 = vmatpush.msra.mxu1 %v160_v2  ;;  %v141_v6 = vld [vmem:[%s646_s6 + $0x60] sm:$0xff]  ;;  %v140_v8 = vld [vmem:[%s646_s6 + $0x58] sm:$0xff]  ;;  %v139_v10 = vld [vmem:[%s646_s6 + $0x50] sm:$0xff]  ;;  %s713_s7 = sld [smem:[%s791_s0 + %s622_s4]]   ;;  %s625_s16 = smov 19  }
   0xa   :  { %166 = vmatpush.msra.mxu0 %v143_v1  ;;  %v157_v7 = vld [vmem:[%s646_s6 + $0xe0] sm:$0xff]  ;;  %v156_v9 = vld [vmem:[%s646_s6 + $0xd8] sm:$0xff]  ;;  %v155_v11 = vld [vmem:[%s646_s6 + $0xd0] sm:$0xff]  ;;  %s557_s15 = sld [smem:[%s791_s0 + %s624_s12]]   ;;  %s626_s20 = smov 20  }
   0xb   :  { %186 = vmatpush.msra.mxu1 %v159_v3  ;;  %v138_v12 = vld [vmem:[%s646_s6 + $0x48] sm:$0xff]  ;;  %v137_v14 = vld [vmem:[%s646_s6 + $0x40] sm:$0xff]  ;;  %v136_v16 = vld [vmem:[%s646_s6 + $0x38] sm:$0xff]  ;;  %s729_s19 = sld [smem:[%s791_s0 + %s625_s16]]   ;;  %s627_s24 = smov 18  }
   0xc   :  { %167 = vmatpush.msra.mxu0 %v142_v4  ;;  %v154_v13 = vld [vmem:[%s646_s6 + $0xc8] sm:$0xff]  ;;  %v153_v15 = vld [vmem:[%s646_s6 + $0xc0] sm:$0xff]  ;;  %v152_v17 = vld [vmem:[%s646_s6 + $0xb8] sm:$0xff]  ;;  %s560_s23 = sld [smem:[%s791_s0 + %s626_s20]]   ;;  %s628_s28 = smov 25  }
   0xd   :  { %187 = vmatpush.msra.mxu1 %v158_v5  ;;  %v135_v18 = vld [vmem:[%s646_s6 + $0x30] sm:$0xff]  ;;  %v134_v20 = vld [vmem:[%s646_s6 + $0x28] sm:$0xff]  ;;  %v133_v22 = vld [vmem:[%s646_s6 + $0x20] sm:$0xff]  ;;  %s558_s27 = sld [smem:[%s791_s0 + %s627_s24]]   ;;  %s629_s2 = smov 24  }
   0xe   :  { %168 = vmatpush.msra.mxu0 %v141_v6  ;;  %v151_v19 = vld [vmem:[%s646_s6 + $0xb0] sm:$0xff]  ;;  %v150_v21 = vld [vmem:[%s646_s6 + $0xa8] sm:$0xff]  ;;  %v149_v23 = vld [vmem:[%s646_s6 + $0xa0] sm:$0xff]  ;;  %s740_s1 = sld [smem:[%s791_s0 + %s628_s28]]   ;;  %s634_s22 = smov 27  }
   0xf   :  { %188 = vmatpush.msra.mxu1 %v157_v7  ;;  %v132_v24 = vld [vmem:[%s646_s6 + $0x18] sm:$0xff]  ;;  %v131_v26 = vld [vmem:[%s646_s6 + $0x10] sm:$0xff]  ;;  %v130_v28 = vld [vmem:[%s646_s6 + $0x8] sm:$0xff]  ;;  %s745_s5 = sld [smem:[%s791_s0 + %s629_s2]]   ;;  %s635_s26 = smov 28  }
  0x10   :  { %169 = vmatpush.msra.mxu0 %v140_v8  ;;  %v148_v25 = vld [vmem:[%s646_s6 + $0x98] sm:$0xff]  ;;  %v147_v27 = vld [vmem:[%s646_s6 + $0x90] sm:$0xff]  ;;  %v146_v29 = vld [vmem:[%s646_s6 + $0x88] sm:$0xff]  ;;  %s636_s30 = smov 29   ;;  %s637_s4 = smov 30  }
  0x11   :  { %189 = vmatpush.msra.mxu1 %v156_v9  ;;  %v129_v30 = vld [vmem:[%s646_s6] sm:$0xff]  ;;  %v127_v33 = vld [vmem:[%s1_s13 + $0x8] sm:$0xff]  ;;  %v209_v34 = vld [vmem:[%s551_s17 + $0x18] sm:$0xff] }
  0x12   :  { %170 = vmatpush.msra.mxu0 %v139_v10  ;;  %v145_v31 = vld [vmem:[%s646_s6 + $0x80] sm:$0xff]  ;;  %255 = vmatpush.msra.mxu3 %v209_v34  ;;  %v208_v35 = vld [vmem:[%s551_s17 + $0x10] sm:$0xff]  ;;  %v207_v36 = vld [vmem:[%s551_s17 + $0x8] sm:$0xff]  ;;  %s630_s6 = smov 21  }
  0x13   :  { %190 = vmatpush.msra.mxu1 %v155_v11  ;;  %v126_v32 = vld [vmem:[%s1_s13] sm:$0xff]  ;;  %v303_v40 = vld [vmem:[%s700_s29 + $0x18] sm:$0xff]  ;;  %v302_v48 = vld [vmem:[%s700_s29 + $0x10] sm:$0xff]  ;;  %s755_s11 = sld [smem:[%s791_s0 + %s630_s6]]  }
  0x14   :  { %171 = vmatpush.msra.mxu0 %v138_v12  ;;  %256 = vmatpush.msra.mxu3 %v208_v35  ;;  %v210_v37 = vld [vmem:[%s552_s21] sm:$0xf]  ;;  %v301_v50 = vld [vmem:[%s700_s29 + $0x8] sm:$0xff]  ;;  %v402_v62 = vld [vmem:[%s740_s1 + $0x18] sm:$0xff] }
  0x15   :  { %191 = vmatpush.msra.mxu1 %v154_v13  ;;  %v206_v38 = vld [vmem:[%s551_s17] sm:$0xff]  ;;  %570 = vmatpush.msk.msra.mxu2 %vm215_vm0, %v210_v37  ;;  %v398_v63 = vld [vmem:[%s745_s5 + $0x18] sm:$0xff]  ;;  %v401_v0 = vld [vmem:[%s740_s1 + $0x10] sm:$0xff] }
  0x16   :  { %172 = vmatpush.msra.mxu0 %v137_v14  ;;  %257 = vmatpush.msra.mxu3 %v207_v36  ;;  %v128_v39 = vld [vmem:[%s547_s25] sm:$0xff]  ;;  %v397_v14 = vld [vmem:[%s745_s5 + $0x10] sm:$0xff]  ;;  %s566_s25 = sld [smem:[%s791_s0 + %s634_s22]]  }
  0x17   :  { %192 = vmatpush.msra.mxu1 %v153_v15  ;;  %571 = vmatmul.msk.f32.vlgmr.msra.gmra.mxu2 %vm211_vm1, %v128_v39  ;;  %v606_v41 = vld [vmem:[%s659_s10] ss:$0 sm:$0xff]  ;;  %s554_s10 = sld [smem:[%s791_s0 + %s623_s8]]  }
  0x18   :  { %173 = vmatpush.msra.mxu0 %v136_v16  ;;  %258 = vmatpush.msra.mxu3 %v206_v38  ;;  %v300_v52 = vld [vmem:[%s700_s29] sm:$0xff]  ;;  %s567_s29 = sld [smem:[%s791_s0 + %s635_s26]]  }
  0x19   :  { %193 = vmatpush.msra.mxu1 %v152_v17  ;;  %v607_v55 = vld [vmem:[%s553_s3] ss:$0 sm:$0xff]  ;;  %v400_v17 = vld [vmem:[%s740_s1 + $0x8] sm:$0xff]  ;;  %s568_s3 = sld [smem:[%s791_s0 + %s636_s30]]  }
  0x1a   :  { %174 = vmatpush.msra.mxu0 %v135_v18  ;;  %320 = vmatpush.msrb.mxu3 %v303_v40  ;;  %v363_v60 = vld [vmem:[%s560_s23] sm:$0xff]  ;;  %v396_v18 = vld [vmem:[%s745_s5 + $0x8] sm:$0xff]  ;;  %s569_s8 = sld [smem:[%s791_s0 + %s637_s4]]  }
  0x1b   :  { %194 = vmatpush.msra.mxu1 %v151_v19  ;;  %v334_v61 = vld [vmem:[%s558_s27] sm:$0xf] }
  0x1c   :  { %175 = vmatpush.msra.mxu0 %v134_v20  ;;  %321 = vmatpush.msrb.mxu3 %v302_v48  ;;  %v609_v1 = vld [vmem:[%s557_s15] ss:$0 sm:$0xff]  ;;  %s632_s15 = smov 26  }
  0x1d   :  { %195 = vmatpush.msra.mxu1 %v150_v21  ;;  %v272_v47 = vld [vmem:[%s554_s10 + $0x18] sm:$0xff]  ;;  %v271_v49 = vld [vmem:[%s554_s10 + $0x10] sm:$0xff]  ;;  %v270_v51 = vld [vmem:[%s554_s10 + $0x8] sm:$0xff]  ;;  %s565_s18 = sld [smem:[%s791_s0 + %s632_s15]]  }
  0x1e   :  { %176 = vmatpush.msra.mxu0 %v133_v22  ;;  %292 = vmatpush.msrb.mxu2 %v272_v47  ;;  %v269_v53 = vld [vmem:[%s554_s10] sm:$0xff]  ;;  %s631_s10 = smov 3   ;;  %v489_v35 = vld [vmem:[%s567_s29 + $0x28] sm:$0xff]  ;;  %v486_v36 = vld [vmem:[%s567_s29 + $0x10] sm:$0xff] }
  0x1f   :  { %196 = vmatpush.msra.mxu1 %v149_v23  ;;  %322 = vmatpush.msrb.mxu3 %v301_v50  ;;  %s548_s14 = sld [smem:[%s791_s0 + %s631_s10]]   ;;  %v608_v6 = vld [vmem:[%s713_s7] ss:$0 sm:$0xff]  ;;  %s633_s7 = smov 23   ;;  %v487_v37 = vld [vmem:[%s567_s29 + $0x18] sm:$0xff] }
  0x20   :  { %177 = vmatpush.msra.mxu0 %v132_v24  ;;  %293 = vmatpush.msrb.mxu2 %v271_v49  ;;  %v610_v13 = vld [vmem:[%s729_s19] ss:$0 sm:$0xff]  ;;  %s562_s21 = sld [smem:[%s791_s0 + %s633_s7]]  }
  0x21   :  { %197 = vmatpush.msra.mxu1 %v148_v25  ;;  %323 = vmatpush.msrb.mxu3 %v300_v52  ;;  %v399_v20 = vld [vmem:[%s740_s1] sm:$0xff] }
  0x22   :  { %178 = vmatpush.msra.mxu0 %v131_v26  ;;  %294 = vmatpush.msrb.mxu2 %v270_v51  ;;  %v395_v21 = vld [vmem:[%s745_s5] sm:$0xff] }
  0x23   :  { %198 = vmatpush.msra.mxu1 %v147_v27  ;;  %v452_v22 = vld [vmem:[%s565_s18 + $0x18] sm:$0xff]  ;;  %v451_v23 = vld [vmem:[%s565_s18 + $0x10] sm:$0xff]  ;;  %v450_v24 = vld [vmem:[%s565_s18 + $0x8] sm:$0xff] }
  0x24   :  { %179 = vmatpush.msra.mxu0 %v130_v28  ;;  %295 = vmatpush.msrb.mxu2 %v269_v53  ;;  %v449_v25 = vld [vmem:[%s565_s18] sm:$0xff] }
  0x25   :  { %199 = vmatpush.msra.mxu1 %v146_v29  ;;  %v331_v8 = vld [vmem:[%s548_s14] sm:$0xff] }
  0x26   :  { %180 = vmatpush.msra.mxu0 %v129_v30  ;;  %575 = vmatpush.msk.msra.mxu2 %vm215_vm0, %v334_v61  ;;  %v611_v26 = vld [vmem:[%s755_s11] ss:$0 sm:$0xff] }
  0x27   :  { %200 = vmatpush.msra.mxu1 %v145_v31  ;;  %181 = vmatmul.f32.vlgmr.msra.gmra.mxu0 %v126_v32  ;;  %v393_v30 = vld [vmem:[%s562_s21] sm:$0x1]  ;;  %v490_v32 = vld [vmem:[%s567_s29 + $0x30] sm:$0xff] }
  0x28   :  { %201 = vmatmul.f32.vlgmr.msra.gmra.mxu1 %v127_v33  ;;  %v394_v31 = vmax.f32 %v393_v30, 0.0  ;;  %v491_v33 = vld [vmem:[%s567_s29 + $0x38] sm:$0xff]  ;;  %513 = vmatpush.msrb.mxu0 %v490_v32  ;;  %v488_v34 = vld [vmem:[%s567_s29 + $0x20] sm:$0xff] }
  0x29   :  { %533 = vmatpush.msrb.mxu1 %v491_v33  ;;  %v484_v38 = vld [vmem:[%s567_s29] sm:$0xff] }
  0x2a   :  { %514 = vmatpush.msrb.mxu0 %v488_v34  ;;  %v492_v49 = vld [vmem:[%s568_s3] sm:$0x3] }
  0x2b   :  { %534 = vmatpush.msrb.mxu1 %v489_v35  ;;  %v494_v50 = vperm.slane %v492_v49, 0  ;;  %v495_v51 = vperm.slane %v492_v49, 1 }
  0x2c   :  { %515 = vmatpush.msrb.mxu0 %v486_v36 }
  0x2d   :  { %535 = vmatpush.msrb.mxu1 %v487_v37 }
  0x2e   :  { %516 = vmatpush.msrb.mxu0 %v484_v38 }
  0x9a   :  { %v236_v54 = vpop.f32.mrf.mxu2 }
  0xa4   :  { %v182_v42 = vpop.f32.mrf.mxu0 }
  0xa5   :  { %v202_v43 = vpop.f32.mrf.mxu1  ;;  %v183_v44 = vadd.f32 %v606_v41, %v182_v42 }
  0xa7   :  { %v203_v45 = vadd.f32 %v202_v43, %v183_v44 }
  0xa9   :  { %v205_v46 = vmax.f32 %v203_v45, 0.0  ;;  %v612_v45 = vld [vmem:[%s566_s25] ss:$0 sm:$0xff] }
  0xab   :  { %572 = vmatmul.msk.f32.vlgmr.msra.gmra.mxu3 %vm239_vm2, %v205_v46 }
  0xac   :  { %387 = vmatpush.msra.mxu3 %v363_v60 }
 0x12e   :  { %v260_v56 = vpop.f32.mrf.mxu3 }
 0x12f   :  { %v261_v57 = vadd.f32 %v260_v56, %v236_v54 }
 0x131   :  { %v267_v58 = vadd.f32 %v607_v55, %v261_v57 }
 0x133   :  { %v268_v59 = vmax.f32 %v267_v58, 0.0 }
 0x135   :  { %573 = vmatmul.msk.f32.vlgmr.msrb.gmra.mxu2 %vm239_vm2, %v268_v59  ;;  %574 = vmatmul.msk.f32.vlgmr.msrb.gmra.mxu3 %vm239_vm2, %v268_v59 }
 0x136   :  { %418 = vmatpush.msrb.mxu2 %v402_v62  ;;  %441 = vmatpush.msrb.mxu3 %v398_v63 }
 0x138   :  { %419 = vmatpush.msrb.mxu2 %v401_v0  ;;  %442 = vmatpush.msrb.mxu3 %v397_v14 }
 0x13a   :  { %420 = vmatpush.msrb.mxu2 %v400_v17  ;;  %443 = vmatpush.msrb.mxu3 %v396_v18 }
 0x13c   :  { %421 = vmatpush.msrb.mxu2 %v399_v20  ;;  %444 = vmatpush.msrb.mxu3 %v395_v21 }
 0x13d   :  { %576 = vmatmul.msk.f32.vlgmr.msra.gmra.mxu2 %vm211_vm1, %v128_v39  ;;  %v485_v39 = vld [vmem:[%s567_s29 + $0x8] sm:$0xff] }
 0x13e   :  { %468 = vmatpush.msra.mxu2 %v452_v22  ;;  %536 = vmatpush.msrb.mxu1 %v485_v39 }
 0x140   :  { %469 = vmatpush.msra.mxu2 %v451_v23 }
 0x142   :  { %470 = vmatpush.msra.mxu2 %v450_v24 }
 0x144   :  { %471 = vmatpush.msra.mxu2 %v449_v25 }
 0x1b8   :  { %v325_v2 = vpop.f32.mrf.mxu3  ;;  %v297_v7 = vpop.f32.mrf.mxu2 }
 0x1b9   :  { %v326_v3 = vadd.f32 %v609_v1, %v325_v2  ;;  %v298_v10 = vadd.f32 %v608_v6, %v297_v7 }
 0x1bb   :  { %v328_v4 = vmul.f32 0.5, %v326_v3 }
 0x1bd   :  { %v329_v5 = vmul.f32 1.442695, %v328_v4 }
 0x1bf   :  { %613 = vpow2.f32 %v329_v5 }
 0x1c0   :  { %v359_v15 = vpop.f32.mrf.mxu2 }
 0x1c1   :  { %v360_v16 = vadd.f32 %v610_v13, %v359_v15 }
 0x1c3   :  { %v362_v19 = vmax.f32 %v360_v16, 0.0 }
 0x1c5   :  { %v614_v9 = vpop.eup %613 }
 0x1c6   :  { %v332_v11 = vmul.f32 %v614_v9, %v331_v8 }
 0x1c8   :  { %v333_v12 = vadd.f32 %v332_v11, %v298_v10 }
 0x1ca   :  { %577 = vmatmul.msk.f32.vlgmr.msra.gmra.mxu3 %vm368_vm3, %v333_v12 }
 0x1d2   :  { %579 = vmatmul.msk.f32.vlgmr.msrb.gmra.mxu3 %vm239_vm2, %v362_v19 }
 0x24d   :  { %v389_v27 = vpop.f32.mrf.mxu3 }
 0x24e   :  { %v390_v28 = vadd.f32 %v611_v26, %v389_v27 }
 0x250   :  { %v392_v29 = vmax.f32 %v390_v28, 0.0 }
 0x252   :  { %578 = vmatmul.msk.f32.vlgmr.msrb.gmra.mxu2 %vm239_vm2, %v392_v29 }
 0x255   :  { %v446_v41 = vpop.f32.mrf.mxu3 }
 0x25a   :  { %580 = vmatmul.msk.f32.vlgmr.msra.gmra.mxu2 %vm239_vm2, %v394_v31 }
 0x2d5   :  { %v423_v40 = vpop.f32.mrf.mxu2 }
 0x2d6   :  { %v447_v43 = vadd.f32 %v446_v41, %v423_v40 }
 0x2dd   :  { %v473_v42 = vpop.f32.mrf.mxu2 }
 0x2de   :  { %v476_v44 = vperm.slane %v473_v42, 0 }
 0x2e0   :  { %v477_v46 = vadd.f32 %v476_v44, %v447_v43 }
 0x2e2   :  { %v482_v47 = vadd.f32 %v612_v45, %v477_v46 }
 0x2e4   :  { %v483_v48 = vmax.f32 %v482_v47, 0.0 }
 0x2e6   :  { %581 = vmatmul.msk.f32.vlgmr.msrb.gmra.mxu0 %vm239_vm2, %v483_v48  ;;  %582 = vmatmul.msk.f32.vlgmr.msrb.gmra.mxu1 %vm239_vm2, %v483_v48 }
 0x363   :  { %v518_v52 = vpop.f32.mrf.mxu0  ;;  %v538_v53 = vpop.f32.mrf.mxu1 }
 0x364   :  { %v519_v54 = vadd.f32 %v518_v52, %v494_v50  ;;  %v539_v55 = vadd.f32 %v538_v53, %v495_v51 }
 0x366   :  { %541 = vst [vmem:[%s569_s8] sm:$0xff] %v519_v54 }
 0x367   :  { %542 = vst [vmem:[%s569_s8 + $0x8] sm:$0xff] %v539_v55 }

</bundles_post_ra>
